<compile_context>
chip_gen: v6e
topology: v6e:2x2x1
jax: 0.10.0
libtpu: 0.0.40
codegen_flags: <defaults>
</compile_context>

<pallas_src>
import math
import jax
import jax.numpy as jnp
from jax import lax
from jax.experimental import pallas as pl
from jax.experimental.pallas import tpu as pltpu

# ---- model config (small, consistent with the module) ----
B = 2            # batch
S = 8            # sequence length
D = 32           # d_model
H = 4            # num_heads
DK = D // H      # d_k
DFF = 64         # d_ff
EPS = 1e-5
BS = B * S       # collapsed batch*seq rows

W_ROWS = 3 * D + DFF     # 160 : wq | wo | w1 | w2 stacked along rows
W_COLS = DFF             # 64  : widest matrix (w1) sets the lane width
V_ROWS = 8               # bq, bo, b1, b2, g1, be1, g2, be2
V_COLS = DFF             # 64


def _layernorm(y, gamma, beta):
    mu = jnp.mean(y, axis=-1, keepdims=True)
    var = jnp.mean((y - mu) * (y - mu), axis=-1, keepdims=True)
    return (y - mu) * lax.rsqrt(var + EPS) * gamma + beta


def encoder_layer_kernel(x_ref, w_ref, v_ref, out_ref):
    f32 = jnp.float32
    x = x_ref[...]                                          # (BS, D)

    # ---- static slices of the packed parameter slabs (cheap sub-tile loads) ----
    wq = w_ref[0:D, 0:D]                                    # (D, D)
    wo = w_ref[D:2 * D, 0:D]                                # (D, D)
    w1 = w_ref[2 * D:3 * D, 0:DFF]                          # (D, DFF)
    w2 = w_ref[3 * D:3 * D + DFF, 0:D]                      # (DFF, D)

    bq = v_ref[0:1, 0:D]
    bo = v_ref[1:2, 0:D]
    b1 = v_ref[2:3, 0:DFF]
    b2 = v_ref[3:4, 0:D]
    g1 = v_ref[4:5, 0:D]
    be1 = v_ref[5:6, 0:D]
    g2 = v_ref[6:7, 0:D]
    be2 = v_ref[7:8, 0:D]

    # ---- single q projection for the whole slab (q == k == v) ----
    q = jnp.dot(x, wq, preferred_element_type=f32) + bq     # (BS, D)

    # ---- head/batch split: one relayout to (B*H, S, DK), batched attention ----
    qh = jnp.transpose(q.reshape(B, S, H, DK), (0, 2, 1, 3))
    qh = qh.reshape(B * H, S, DK)                           # (B*H, S, DK)

    scale = 1.0 / math.sqrt(DK)
    scores = lax.dot_general(
        qh, qh, (((2,), (2,)), ((0,), (0,))),
        preferred_element_type=f32) * scale                 # (B*H, S, S)

    # softmax over keys (exact divide; EUP exp)
    m = jnp.max(scores, axis=-1, keepdims=True)
    e = jnp.exp(scores - m)
    attn = e / jnp.sum(e, axis=-1, keepdims=True)

    # attn @ v, batched over (batch*head)
    ctx = lax.dot_general(attn, qh, (((2,), (1,)), ((0,), (0,))),
                          preferred_element_type=f32)       # (B*H, S, DK)

    # ---- fold head-concat into ONE K=D output projection ----
    ctx2 = jnp.transpose(ctx.reshape(B, H, S, DK), (0, 2, 1, 3)).reshape(BS, D)
    attn_out = jnp.dot(ctx2, wo, preferred_element_type=f32) + bo   # (BS, D)

    # ---- residual + LayerNorm 1 ----
    y = _layernorm(x + attn_out, g1, be1)

    # ---- position-wise feed forward ----
    h1 = jnp.maximum(jnp.dot(y, w1, preferred_element_type=f32) + b1, 0.0)
    f = jnp.dot(h1, w2, preferred_element_type=f32) + b2

    # ---- residual + LayerNorm 2 ----
    out_ref[...] = _layernorm(y + f, g2, be2)


def _pack_params(params):
    """Pack 13 small parameter arrays into 2 slabs (wrapper-side plumbing)."""
    w = jnp.zeros((W_ROWS, W_COLS), jnp.float32)
    w = w.at[0:D, 0:D].set(params["wq"])
    w = w.at[D:2 * D, 0:D].set(params["wo"])
    w = w.at[2 * D:3 * D, 0:DFF].set(params["w1"])
    w = w.at[3 * D:3 * D + DFF, 0:D].set(params["w2"])

    v = jnp.zeros((V_ROWS, V_COLS), jnp.float32)
    v = v.at[0:1, 0:D].set(params["bq"])
    v = v.at[1:2, 0:D].set(params["bo"])
    v = v.at[2:3, 0:DFF].set(params["b1"])
    v = v.at[3:4, 0:D].set(params["b2"])
    v = v.at[4:5, 0:D].set(params["g1"])
    v = v.at[5:6, 0:D].set(params["be1"])
    v = v.at[6:7, 0:D].set(params["g2"])
    v = v.at[7:8, 0:D].set(params["be2"])
    return w, v


def encoder_layer(x, params):
    """x: (B, S, D) float32. params: dict of weights stored as (in, out)."""
    x2 = x.reshape(BS, D)                     # collapse batch into one slab
    w_slab, v_slab = _pack_params(params)     # 13 inputs -> 2 slabs

    vmem = lambda: pl.BlockSpec(memory_space=pltpu.MemorySpace.VMEM)
    out = pl.pallas_call(
        encoder_layer_kernel,
        out_shape=jax.ShapeDtypeStruct((BS, D), jnp.float32),
        in_specs=[vmem(), vmem(), vmem()],
        out_specs=vmem(),
    )(x2, w_slab, v_slab)

    return out.reshape(B, S, D)


def reference(x, p):
    """Pure-JAX reference matching the PyTorch forward semantics."""
    q = x @ p["wq"] + p["bq"]                    # (B, S, D); q == k == v
    qh = q.reshape(B, S, H, DK).transpose(0, 2, 1, 3)   # (B, H, S, DK)
    scores = jnp.einsum("bhqd,bhkd->bhqk", qh, qh) / math.sqrt(DK)
    attn = jax.nn.softmax(scores, axis=-1)
    ao = jnp.einsum("bhqk,bhkd->bhqd", attn, qh)
    ao = ao.transpose(0, 2, 1, 3).reshape(B, S, D)
    ao = ao @ p["wo"] + p["bo"]

    def ln(y, g, b):
        mu = jnp.mean(y, -1, keepdims=True)
        var = jnp.mean((y - mu) ** 2, -1, keepdims=True)
        return (y - mu) / jnp.sqrt(var + EPS) * g + b

    y = ln(x + ao, p["g1"], p["be1"])
    f = jnp.maximum(y @ p["w1"] + p["b1"], 0.0) @ p["w2"] + p["b2"]
    return ln(y + f, p["g2"], p["be2"])


if __name__ == "__main__":
    key = jax.random.PRNGKey(0)
    ks = jax.random.split(key, 16)
    sc = 0.1
    params = {
        "wq": sc * jax.random.normal(ks[0], (D, D), jnp.float32),
        "bq": sc * jax.random.normal(ks[1], (1, D), jnp.float32),
        "wo": sc * jax.random.normal(ks[2], (D, D), jnp.float32),
        "bo": sc * jax.random.normal(ks[3], (1, D), jnp.float32),
        "w1": sc * jax.random.normal(ks[4], (D, DFF), jnp.float32),
        "b1": sc * jax.random.normal(ks[5], (1, DFF), jnp.float32),
        "w2": sc * jax.random.normal(ks[6], (DFF, D), jnp.float32),
        "b2": sc * jax.random.normal(ks[7], (1, D), jnp.float32),
        # LayerNorm params (default-ish init, slightly perturbed, deterministic)
        "g1": jnp.ones((1, D), jnp.float32) + 0.01 * jax.random.normal(ks[8], (1, D)),
        "be1": 0.01 * jax.random.normal(ks[9], (1, D), jnp.float32),
        "g2": jnp.ones((1, D), jnp.float32) + 0.01 * jax.random.normal(ks[10], (1, D)),
        "be2": 0.01 * jax.random.normal(ks[11], (1, D), jnp.float32),
    }

    x = jax.random.normal(ks[12], (B, S, D), jnp.float32)

    out = encoder_layer(x, params)
    out = jax.block_until_ready(out)

    ref = reference(x, params)
    assert out.shape == (B, S, D)
    assert jnp.allclose(out, ref, atol=1e-4, rtol=1e-4), (
        float(jnp.max(jnp.abs(out - ref))))

    print("KERNEL_OK")
</pallas_src>

<mosaic_0001>
module attributes {stable_mosaic.version = 11 : i64} {
  func.func @encoder_layer_kernel(%arg0: memref<16x32xf32, #tpu.memory_space<vmem>>, %arg1: memref<160x64xf32, #tpu.memory_space<vmem>>, %arg2: memref<8x64xf32, #tpu.memory_space<vmem>>, %arg3: memref<16x32xf32, #tpu.memory_space<vmem>>) attributes {dimension_semantics = [], scalar_prefetch = 0 : i64, scratch_operands = 0 : i64, tpu.core_type = #tpu.core_type<tc>} {
    %c0 = arith.constant 0 : index
    %c0_0 = arith.constant 0 : index
    %0 = vector.load %arg0[%c0, %c0_0] : memref<16x32xf32, #tpu.memory_space<vmem>>, vector<16x32xf32>
    %c0_1 = arith.constant 0 : index
    %c0_2 = arith.constant 0 : index
    %1 = vector.load %arg1[%c0_1, %c0_2] : memref<160x64xf32, #tpu.memory_space<vmem>>, vector<32x32xf32>
    %c32 = arith.constant 32 : index
    %c0_3 = arith.constant 0 : index
    %2 = vector.load %arg1[%c32, %c0_3] : memref<160x64xf32, #tpu.memory_space<vmem>>, vector<32x32xf32>
    %c64 = arith.constant 64 : index
    %c0_4 = arith.constant 0 : index
    %3 = vector.load %arg1[%c64, %c0_4] : memref<160x64xf32, #tpu.memory_space<vmem>>, vector<32x64xf32>
    %c96 = arith.constant 96 : index
    %c0_5 = arith.constant 0 : index
    %4 = vector.load %arg1[%c96, %c0_5] : memref<160x64xf32, #tpu.memory_space<vmem>>, vector<64x32xf32>
    %c0_6 = arith.constant 0 : index
    %c0_7 = arith.constant 0 : index
    %5 = vector.load %arg2[%c0_6, %c0_7] : memref<8x64xf32, #tpu.memory_space<vmem>>, vector<1x32xf32>
    %c1 = arith.constant 1 : index
    %c0_8 = arith.constant 0 : index
    %6 = vector.load %arg2[%c1, %c0_8] : memref<8x64xf32, #tpu.memory_space<vmem>>, vector<1x32xf32>
    %c2 = arith.constant 2 : index
    %c0_9 = arith.constant 0 : index
    %7 = vector.load %arg2[%c2, %c0_9] : memref<8x64xf32, #tpu.memory_space<vmem>>, vector<1x64xf32>
    %c3 = arith.constant 3 : index
    %c0_10 = arith.constant 0 : index
    %8 = vector.load %arg2[%c3, %c0_10] : memref<8x64xf32, #tpu.memory_space<vmem>>, vector<1x32xf32>
    %c4 = arith.constant 4 : index
    %c0_11 = arith.constant 0 : index
    %9 = vector.load %arg2[%c4, %c0_11] : memref<8x64xf32, #tpu.memory_space<vmem>>, vector<1x32xf32>
    %c5 = arith.constant 5 : index
    %c0_12 = arith.constant 0 : index
    %10 = vector.load %arg2[%c5, %c0_12] : memref<8x64xf32, #tpu.memory_space<vmem>>, vector<1x32xf32>
    %c6 = arith.constant 6 : index
    %c0_13 = arith.constant 0 : index
    %11 = vector.load %arg2[%c6, %c0_13] : memref<8x64xf32, #tpu.memory_space<vmem>>, vector<1x32xf32>
    %c7 = arith.constant 7 : index
    %c0_14 = arith.constant 0 : index
    %12 = vector.load %arg2[%c7, %c0_14] : memref<8x64xf32, #tpu.memory_space<vmem>>, vector<1x32xf32>
    %cst = arith.constant dense<0.000000e+00> : vector<16x32xf32>
    %13 = tpu.matmul %0, %1, %cst {dimension_numbers = #tpu.dot_dimension_numbers<[1], [0], [0], [1], [0, 0, 1, 1], [], []>} : vector<16x32xf32>, vector<32x32xf32>, vector<16x32xf32> -> vector<16x32xf32>
    %14 = vector.broadcast %5 : vector<1x32xf32> to vector<16x32xf32>
    %15 = arith.addf %13, %14 : vector<16x32xf32>
    %16 = vector.shape_cast %15 : vector<16x32xf32> to vector<2x8x4x8xf32>
    %17 = tpu.transpose %16, [0, 2, 1, 3] : vector<2x8x4x8xf32> -> vector<2x4x8x8xf32>
    %18 = vector.shape_cast %17 : vector<2x4x8x8xf32> to vector<8x8x8xf32>
    %cst_15 = arith.constant dense<0.000000e+00> : vector<8x8x8xf32>
    %19 = tpu.matmul %18, %18, %cst_15 {dimension_numbers = #tpu.dot_dimension_numbers<[2], [2], [1], [1], [0, 0, 0, 1, 1, 1], [0], [0]>} : vector<8x8x8xf32>, vector<8x8x8xf32>, vector<8x8x8xf32> -> vector<8x8x8xf32>
    %cst_16 = arith.constant 0.353553385 : f32
    %20 = vector.broadcast %cst_16 : f32 to vector<8x8x8xf32>
    %21 = arith.mulf %19, %20 : vector<8x8x8xf32>
    %cst_17 = arith.constant dense<0xFF800000> : vector<8x8xf32>
    %22 = vector.multi_reduction <maximumf>, %21, %cst_17 [2] : vector<8x8x8xf32> to vector<8x8xf32>
    %23 = vector.shape_cast %22 : vector<8x8xf32> to vector<8x8x1xf32>
    %24 = vector.broadcast %23 : vector<8x8x1xf32> to vector<8x8x8xf32>
    %25 = arith.subf %21, %24 : vector<8x8x8xf32>
    %26 = math.exp %25 : vector<8x8x8xf32>
    %cst_18 = arith.constant dense<0.000000e+00> : vector<8x8xf32>
    %27 = vector.multi_reduction <add>, %26, %cst_18 [2] : vector<8x8x8xf32> to vector<8x8xf32>
    %28 = vector.shape_cast %27 : vector<8x8xf32> to vector<8x8x1xf32>
    %29 = vector.broadcast %28 : vector<8x8x1xf32> to vector<8x8x8xf32>
    %30 = arith.divf %26, %29 : vector<8x8x8xf32>
    %cst_19 = arith.constant dense<0.000000e+00> : vector<8x8x8xf32>
    %31 = tpu.matmul %30, %18, %cst_19 {dimension_numbers = #tpu.dot_dimension_numbers<[2], [1], [1], [2], [0, 0, 0, 1, 1, 2], [0], [0]>} : vector<8x8x8xf32>, vector<8x8x8xf32>, vector<8x8x8xf32> -> vector<8x8x8xf32>
    %32 = vector.shape_cast %31 : vector<8x8x8xf32> to vector<2x4x8x8xf32>
    %33 = tpu.transpose %32, [0, 2, 1, 3] : vector<2x4x8x8xf32> -> vector<2x8x4x8xf32>
    %34 = vector.shape_cast %33 : vector<2x8x4x8xf32> to vector<16x32xf32>
    %cst_20 = arith.constant dense<0.000000e+00> : vector<16x32xf32>
    %35 = tpu.matmul %34, %2, %cst_20 {dimension_numbers = #tpu.dot_dimension_numbers<[1], [0], [0], [1], [0, 0, 1, 1], [], []>} : vector<16x32xf32>, vector<32x32xf32>, vector<16x32xf32> -> vector<16x32xf32>
    %36 = vector.broadcast %6 : vector<1x32xf32> to vector<16x32xf32>
    %37 = arith.addf %35, %36 : vector<16x32xf32>
    %38 = arith.addf %0, %37 : vector<16x32xf32>
    %cst_21 = arith.constant dense<0.000000e+00> : vector<16xf32>
    %39 = vector.multi_reduction <add>, %38, %cst_21 [1] : vector<16x32xf32> to vector<16xf32>
    %40 = vector.shape_cast %39 : vector<16xf32> to vector<16x1xf32>
    %cst_22 = arith.constant 3.200000e+01 : f32
    %41 = vector.broadcast %cst_22 : f32 to vector<16x1xf32>
    %42 = arith.divf %40, %41 : vector<16x1xf32>
    %43 = vector.broadcast %42 : vector<16x1xf32> to vector<16x32xf32>
    %44 = arith.subf %38, %43 : vector<16x32xf32>
    %45 = vector.broadcast %42 : vector<16x1xf32> to vector<16x32xf32>
    %46 = arith.subf %38, %45 : vector<16x32xf32>
    %47 = arith.mulf %44, %46 : vector<16x32xf32>
    %cst_23 = arith.constant dense<0.000000e+00> : vector<16xf32>
    %48 = vector.multi_reduction <add>, %47, %cst_23 [1] : vector<16x32xf32> to vector<16xf32>
    %49 = vector.shape_cast %48 : vector<16xf32> to vector<16x1xf32>
    %cst_24 = arith.constant 3.200000e+01 : f32
    %50 = vector.broadcast %cst_24 : f32 to vector<16x1xf32>
    %51 = arith.divf %49, %50 : vector<16x1xf32>
    %52 = vector.broadcast %42 : vector<16x1xf32> to vector<16x32xf32>
    %53 = arith.subf %38, %52 : vector<16x32xf32>
    %cst_25 = arith.constant 9.99999974E-6 : f32
    %54 = vector.broadcast %cst_25 : f32 to vector<16x1xf32>
    %55 = arith.addf %51, %54 : vector<16x1xf32>
    %56 = math.rsqrt %55 : vector<16x1xf32>
    %57 = vector.broadcast %56 : vector<16x1xf32> to vector<16x32xf32>
    %58 = arith.mulf %53, %57 : vector<16x32xf32>
    %59 = vector.broadcast %9 : vector<1x32xf32> to vector<16x32xf32>
    %60 = arith.mulf %58, %59 : vector<16x32xf32>
    %61 = vector.broadcast %10 : vector<1x32xf32> to vector<16x32xf32>
    %62 = arith.addf %60, %61 : vector<16x32xf32>
    %cst_26 = arith.constant dense<0.000000e+00> : vector<16x64xf32>
    %63 = tpu.matmul %62, %3, %cst_26 {dimension_numbers = #tpu.dot_dimension_numbers<[1], [0], [0], [1], [0, 0, 1, 1], [], []>} : vector<16x32xf32>, vector<32x64xf32>, vector<16x64xf32> -> vector<16x64xf32>
    %64 = vector.broadcast %7 : vector<1x64xf32> to vector<16x64xf32>
    %65 = arith.addf %63, %64 : vector<16x64xf32>
    %cst_27 = arith.constant 0.000000e+00 : f32
    %66 = vector.broadcast %cst_27 : f32 to vector<16x64xf32>
    %67 = arith.maximumf %65, %66 : vector<16x64xf32>
    %cst_28 = arith.constant dense<0.000000e+00> : vector<16x32xf32>
    %68 = tpu.matmul %67, %4, %cst_28 {dimension_numbers = #tpu.dot_dimension_numbers<[1], [0], [0], [1], [0, 0, 1, 1], [], []>} : vector<16x64xf32>, vector<64x32xf32>, vector<16x32xf32> -> vector<16x32xf32>
    %69 = vector.broadcast %8 : vector<1x32xf32> to vector<16x32xf32>
    %70 = arith.addf %68, %69 : vector<16x32xf32>
    %71 = arith.addf %62, %70 : vector<16x32xf32>
    %cst_29 = arith.constant dense<0.000000e+00> : vector<16xf32>
    %72 = vector.multi_reduction <add>, %71, %cst_29 [1] : vector<16x32xf32> to vector<16xf32>
    %73 = vector.shape_cast %72 : vector<16xf32> to vector<16x1xf32>
    %cst_30 = arith.constant 3.200000e+01 : f32
    %74 = vector.broadcast %cst_30 : f32 to vector<16x1xf32>
    %75 = arith.divf %73, %74 : vector<16x1xf32>
    %76 = vector.broadcast %75 : vector<16x1xf32> to vector<16x32xf32>
    %77 = arith.subf %71, %76 : vector<16x32xf32>
    %78 = vector.broadcast %75 : vector<16x1xf32> to vector<16x32xf32>
    %79 = arith.subf %71, %78 : vector<16x32xf32>
    %80 = arith.mulf %77, %79 : vector<16x32xf32>
    %cst_31 = arith.constant dense<0.000000e+00> : vector<16xf32>
    %81 = vector.multi_reduction <add>, %80, %cst_31 [1] : vector<16x32xf32> to vector<16xf32>
    %82 = vector.shape_cast %81 : vector<16xf32> to vector<16x1xf32>
    %cst_32 = arith.constant 3.200000e+01 : f32
    %83 = vector.broadcast %cst_32 : f32 to vector<16x1xf32>
    %84 = arith.divf %82, %83 : vector<16x1xf32>
    %85 = vector.broadcast %75 : vector<16x1xf32> to vector<16x32xf32>
    %86 = arith.subf %71, %85 : vector<16x32xf32>
    %cst_33 = arith.constant 9.99999974E-6 : f32
    %87 = vector.broadcast %cst_33 : f32 to vector<16x1xf32>
    %88 = arith.addf %84, %87 : vector<16x1xf32>
    %89 = math.rsqrt %88 : vector<16x1xf32>
    %90 = vector.broadcast %89 : vector<16x1xf32> to vector<16x32xf32>
    %91 = arith.mulf %86, %90 : vector<16x32xf32>
    %92 = vector.broadcast %11 : vector<1x32xf32> to vector<16x32xf32>
    %93 = arith.mulf %91, %92 : vector<16x32xf32>
    %94 = vector.broadcast %12 : vector<1x32xf32> to vector<16x32xf32>
    %95 = arith.addf %93, %94 : vector<16x32xf32>
    %c0_34 = arith.constant 0 : index
    %c0_35 = arith.constant 0 : index
    %96 = vector.load %arg3[%c0_34, %c0_35] : memref<16x32xf32, #tpu.memory_space<vmem>>, vector<16x32xf32>
    tpu.vector_store %arg3[%c0_34, %c0_35], %95 {strides = array<i32>} : memref<16x32xf32, #tpu.memory_space<vmem>>, vector<16x32xf32>,
    return
  }
}

</mosaic_0001>

<bundles_post_ra>
// kernel: tpu_custom_call.1
= control target key start
LH: loop header
LB: loop body
LE: loop exit
PB: predicated region body
PF: predicated region fallthrough
CT: control target
= control target key end

     0   :  { %vm49_vm0 = vcmask 261120   ;;  %s3003_s0 = inlined_call_operand.vmem [shape: f32[16,32], index: 0, kind: input, shape index: {}]   ;;  %s3004_s1 = inlined_call_operand.vmem [shape: f32[160,64], index: 1, kind: input, shape index: {}]   ;;  %s3005_s2 = inlined_call_operand.vmem [shape: f32[8,64], index: 2, kind: input, shape index: {}]   ;;  %s3006_s3 = inlined_call_operand.hbm [shape: f32[16,32], index: 3, kind: output, shape index: {}]  }
   0x1   :  { %v20_v0 = vld [vmem:[%s3004_s1 + $0x18] sm:$0xff]  ;;  %v19_v1 = vld [vmem:[%s3004_s1 + $0x10] sm:$0xff]  ;;  %v2704_v2 = vld [vmem:[%s3003_s0] sm:$0xff] }
   0x2   :  { %2457 = vmatprep.subr.mxu1 %v20_v0  ;;  %v18_v3 = vld [vmem:[%s3004_s1 + $0x8] sm:$0xff]  ;;  %2465 = vmatprep.mubr.msk.f32.mxu1 %vm49_vm0, %v2704_v2 }
   0x3   :  { %2458 = vmatpush3.msra.mxu1 %v20_v0 }
   0x4   :  { %8 = vsyncpa [#allocation3], 0  ;;  %2459 = vmatprep.subr.mxu1 %v19_v1  ;;  %v17_v4 = vld [vmem:[%s3004_s1] sm:$0xff]  ;;  %v2717_v5 = vld [vmem:[%s3003_s0 + $0x8] sm:$0xff]  ;;  %s2663_s26 = smov 104   ;;  %s2664_s27 = smov 120   ;;  %v156_v14 = vlaneseq }
   0x5   :  { %2460 = vmatpush3.msra.mxu1 %v19_v1  ;;  %v2349_v7 = vld [vmem:[%s3005_s2] ss:$0 sm:$0xff]  ;;  %s2665_s0 = smov 112   ;;  %v2666_v11 = vmov 0.0   ;;  %vm2667_vm1 = vmmov 0   ;;  %vm423_vm2 = vcmask 64512  }
   0x6   :  { %2461 = vmatprep.subr.mxu1 %v18_v3  ;;  %2478 = vmatprep.subr.mxu0 %v2666_v11  ;;  %v2668_v12 = vmov 1983009808   ;;  %v2669_v15 = vmov 1934713408   ;;  %v157_v18 = vshrl.u32 %v156_v14, 7  ;;  %s2670_s9 = smov 8  }
   0x7   :  { %2462 = vmatpush3.msra.mxu1 %v18_v3  ;;  %2480 = vmatprep.mubr.msk.f32.mxu0 %vm2667_vm1, %v2666_v11  ;;  %v154_v13 = vunpack.c.l.s4 %v2668_v12  ;;  %v186_v16 = vunpack.c.l.s4 %v2669_v15  ;;  %s2671_s10 = smov 16   ;;  %s2672_s11 = smov 24   ;;  %vm1986_vm3 = vcmask 130048   ;;  %vm1989_vm4 = vcmask 195584  }
   0x8   :  { %2463 = vmatprep.subr.mxu1 %v17_v4  ;;  %vm2209_vm5 = vcmask 523264   ;;  %s2673_s22 = smov [#allocation2]  }
   0x9   :  { %2464 = vmatpush3.msra.mxu1 %v17_v4  ;;  %v155_v17 = vunpack.c.0.s8 %v154_v13  ;;  %v187_v21 = vunpack.c.0.s8 %v186_v16  ;;  %s2338_s23 = sshll.u32 %s2673_s22, 4  ;;  %s2339_s23 = int_to_ptr.vmem [resolvable:$true] %s2338_s23 }
   0xa   :  { %2466 = vmatmul.mubr.msk.f32.vlgmr.msra.gmra.mxu1 %vm49_vm0, %v2717_v5  ;;  %2468 = vmatprep.subr.mxu1 %v2666_v11  ;;  %s2641_s24 = scalar_lea.vmem %s2339_s23, 256  ;;  %p2646_p1 = scmp.lt.s32.totalorder %s2339_s23, %s2339_s23 }
   0xb   :  { %2470 = vmatprep.mubr.msk.f32.mxu1 %vm2667_vm1, %v2666_v11  ;;  %v2730_v22 = vsub.s32 %v155_v17, %v157_v18  ;;  %v2732_v29 = vsub.s32 %v187_v21, %v157_v18  ;;  %p2642_p0 = scmp.ne.s32.totalorder %s2339_s23, %s2641_s24  ;;  %p2647_p2 = scmp.lt.s32.totalorder %s2641_s24, %s2641_s24 }
   0xd   :  { %p2648_p3 = por %p2647_p2, %p2646_p1 }
   0xf   :  { %p2649_p4 = pnand %p2648_p3, %p2642_p0 }
  0xca   :  { %v2467_v6 = vpop.f32.mrf.mxu1 }
  0xcb   :  { %v128_v10 = vadd.f32 %v2467_v6, %v2349_v7 }
  0xcc   :  { %v122_v8 = vpop.f32.mrf.mxu1 }
  0xcd   :  { %v123_v9 = vadd.f32 %v2349_v7, %v122_v8 }
  0xcf   :  { %145 = vrot.lane.b32.xlu1 %v123_v9, %s2663_s26  ;;  %133 = vrot.lane.b32.xlu0 %v123_v9, %s2664_s27 }
  0xd3   :  { %135 = vrot.lane.b32.xlu1 %v128_v10, %s2664_s27  ;;  %139 = vrot.lane.b32.xlu0 %v123_v9, %s2665_s0 }
  0xd7   :  { %147 = vrot.lane.b32.xlu1 %v128_v10, %s2663_s26  ;;  %141 = vrot.lane.b32.xlu0 %v128_v10, %s2665_s0 }
 0x141   :  { %v146_v19 = vpop.permute.xlu1 %145  ;;  %v134_v20 = vpop.permute.xlu0 %133 }
 0x142   :  { %v167_v23 = vcombine.low %v134_v20, %v146_v19  ;;  %v168_v24 = vcombine.high %v134_v20, %v146_v19 }
 0x144   :  { %v175_v30 = vrot.slane %v167_v23, %v2730_v22  ;;  %v182_v31 = vrot.slane %v168_v24, %v2730_v22 }
 0x145   :  { %v136_v25 = vpop.permute.xlu1 %135  ;;  %v140_v26 = vpop.permute.xlu0 %139 }
 0x146   :  { %v151_v27 = vcombine.low %v123_v9, %v140_v26  ;;  %v152_v28 = vcombine.high %v123_v9, %v140_v26 }
 0x148   :  { %v159_v32 = vrot.slane %v151_v27, %v2730_v22  ;;  %v166_v33 = vrot.slane %v152_v28, %v2730_v22 }
 0x149   :  { %v148_v34 = vpop.permute.xlu1 %147  ;;  %v142_v35 = vpop.permute.xlu0 %141 }
 0x14a   :  { %v183_v36 = vcombine.low %v159_v32, %v175_v30  ;;  %v184_v37 = vcombine.high %v159_v32, %v175_v30  ;;  %v199_v38 = vcombine.low %v166_v33, %v182_v31  ;;  %v200_v39 = vcombine.high %v166_v33, %v182_v31 }
 0x14b   :  { %v235_v40 = vcombine.low %v136_v25, %v148_v34  ;;  %v236_v41 = vcombine.high %v136_v25, %v148_v34  ;;  %v219_v42 = vcombine.low %v128_v10, %v142_v35  ;;  %v220_v43 = vcombine.high %v128_v10, %v142_v35 }
 0x14c   :  { %v191_v44 = vrot.slane %v183_v36, %v2732_v29  ;;  %v198_v45 = vrot.slane %v184_v37, %v2732_v29  ;;  %v207_v46 = vrot.slane %v199_v38, %v2732_v29  ;;  %v214_v47 = vrot.slane %v200_v39, %v2732_v29 }
 0x14d   :  { %v243_v48 = vrot.slane %v235_v40, %v2730_v22  ;;  %v250_v49 = vrot.slane %v236_v41, %v2730_v22  ;;  %v227_v50 = vrot.slane %v219_v42, %v2730_v22  ;;  %v234_v51 = vrot.slane %v220_v43, %v2730_v22 }
 0x14e   :  { %v287_v52 = vcombine.low %v191_v44, %v198_v45  ;;  %v2352_v53 = vcombine.high %v191_v44, %v198_v45  ;;  %v303_v54 = vcombine.low %v207_v46, %v214_v47  ;;  %v2353_v55 = vcombine.high %v207_v46, %v214_v47 }
 0x14f   :  { %v251_v56 = vcombine.low %v227_v50, %v243_v48  ;;  %v252_v57 = vcombine.high %v227_v50, %v243_v48  ;;  %v267_v58 = vcombine.low %v234_v51, %v250_v49  ;;  %v268_v59 = vcombine.high %v234_v51, %v250_v49 }
 0x150   :  { %v294_v60 = vrot.slane %v287_v52, %v2730_v22  ;;  %v302_v61 = vrot.slane %v2352_v53, %v2730_v22  ;;  %v310_v62 = vrot.slane %v303_v54, %v2730_v22  ;;  %v318_v63 = vrot.slane %v2353_v55, %v2730_v22 }
 0x151   :  { %v259_v0 = vrot.slane %v251_v56, %v2732_v29  ;;  %v266_v1 = vrot.slane %v252_v57, %v2732_v29  ;;  %v275_v3 = vrot.slane %v267_v58, %v2732_v29  ;;  %v282_v4 = vrot.slane %v268_v59, %v2732_v29 }
 0x152   :  { %v319_v6 = vcombine.low %v294_v60, %v302_v61  ;;  %v335_v7 = vcombine.low %v310_v62, %v318_v63  ;;  %v320_v8 = vcombine.high %v294_v60, %v302_v61  ;;  %v336_v9 = vcombine.high %v310_v62, %v318_v63 }
 0x153   :  { %v355_v10 = vcombine.low %v259_v0, %v266_v1  ;;  %v2354_v12 = vcombine.high %v259_v0, %v266_v1  ;;  %v371_v13 = vcombine.low %v275_v3, %v282_v4  ;;  %v2355_v14 = vcombine.high %v275_v3, %v282_v4 }
 0x154   :  { %v327_v15 = vrot.slane %v319_v6, %v2732_v29  ;;  %v343_v16 = vrot.slane %v335_v7, %v2732_v29  ;;  %v334_v17 = vrot.slane %v320_v8, %v2732_v29  ;;  %v350_v18 = vrot.slane %v336_v9, %v2732_v29 }
 0x155   :  { %v362_v19 = vrot.slane %v355_v10, %v2730_v22  ;;  %v370_v20 = vrot.slane %v2354_v12, %v2730_v22  ;;  %v378_v21 = vrot.slane %v371_v13, %v2730_v22  ;;  %v386_v23 = vrot.slane %v2355_v14, %v2730_v22 }
 0x156   :  { %v351_v24 = vcombine.low %v327_v15, %v343_v16  ;;  %v2762_v25 = vcombine.low %v334_v17, %v350_v18  ;;  %v352_v33 = vcombine.high %v327_v15, %v343_v16  ;;  %v2785_v37 = vcombine.high %v334_v17, %v350_v18 }
 0x157   :  { %v387_v26 = vcombine.low %v362_v19, %v370_v20  ;;  %v388_v27 = vcombine.high %v362_v19, %v370_v20  ;;  %v403_v28 = vcombine.low %v378_v21, %v386_v23  ;;  %v404_v30 = vcombine.high %v378_v21, %v386_v23 }
 0x158   :  { %2469 = vmatpush3.xpose.msk.msra.mxu1 %vm423_vm2, %v351_v24  ;;  %2479 = vmatpush3.xpose.msk.msra.mxu0 %vm423_vm2, %v2762_v25 }
 0x159   :  { %2473 = vmatprep.subr.mxu1 %v2666_v11  ;;  %2488 = vmatprep.subr.mxu0 %v2666_v11  ;;  %v395_v31 = vrot.slane %v387_v26, %v2732_v29  ;;  %v411_v32 = vrot.slane %v403_v28, %v2732_v29  ;;  %v402_v35 = vrot.slane %v388_v27, %v2732_v29 }
 0x15a   :  { %v418_v36 = vrot.slane %v404_v30, %v2732_v29 }
 0x15b   :  { %2471 = vmatmul.mubr.msk.f32.vlgmr.msra.gmra.mxu1 %vm423_vm2, %v351_v24  ;;  %2481 = vmatmul.mubr.msk.f32.vlgmr.msra.gmra.mxu0 %vm423_vm2, %v2762_v25  ;;  %v2774_v34 = vcombine.low %v395_v31, %v411_v32  ;;  %v2803_v39 = vcombine.high %v395_v31, %v411_v32 }
 0x15c   :  { %2474 = vmatpush3.xpose.msk.msra.mxu1 %vm423_vm2, %v352_v33  ;;  %2475 = vmatprep.mubr.msk.f32.mxu1 %vm2667_vm1, %v2666_v11  ;;  %v2790_v38 = vcombine.low %v402_v35, %v418_v36  ;;  %v2815_v40 = vcombine.high %v402_v35, %v418_v36 }
 0x15d   :  { %2489 = vmatpush3.xpose.msk.msra.mxu0 %vm423_vm2, %v2774_v34  ;;  %2490 = vmatprep.mubr.msk.f32.mxu0 %vm2667_vm1, %v2666_v11 }
 0x15e   :  { %2483 = vmatprep.subr.mxu1 %v2666_v11  ;;  %2498 = vmatprep.subr.mxu0 %v2666_v11 }
 0x15f   :  { %2476 = vmatmul.mubr.msk.f32.vlgmr.msra.gmra.mxu1 %vm423_vm2, %v352_v33 }
 0x160   :  { %2491 = vmatmul.mubr.msk.f32.vlgmr.msra.gmra.mxu0 %vm423_vm2, %v2774_v34  ;;  %2484 = vmatpush3.xpose.msk.msra.mxu1 %vm423_vm2, %v2785_v37 }
 0x161   :  { %2499 = vmatpush3.xpose.msk.msra.mxu0 %vm423_vm2, %v2790_v38  ;;  %2485 = vmatprep.mubr.msk.f32.mxu1 %vm2667_vm1, %v2666_v11 }
 0x162   :  { %2500 = vmatprep.mubr.msk.f32.mxu0 %vm2667_vm1, %v2666_v11  ;;  %2493 = vmatprep.subr.mxu1 %v2666_v11 }
 0x163   :  { %2486 = vmatmul.mubr.msk.f32.vlgmr.msra.gmra.mxu1 %vm423_vm2, %v2785_v37  ;;  %2508 = vmatprep.subr.mxu0 %v2666_v11 }
 0x164   :  { %2501 = vmatmul.mubr.msk.f32.vlgmr.msra.gmra.mxu0 %vm423_vm2, %v2790_v38  ;;  %2494 = vmatpush3.xpose.msk.msra.mxu1 %vm423_vm2, %v2803_v39 }
 0x165   :  { %2509 = vmatpush3.msra.mxu0 %v351_v24  ;;  %2495 = vmatprep.mubr.msk.f32.mxu1 %vm2667_vm1, %v2666_v11 }
 0x166   :  { %2503 = vmatprep.subr.mxu1 %v2666_v11  ;;  %2510 = vmatprep.mubr.msk.f32.mxu0 %vm2667_vm1, %v2666_v11 }
 0x167   :  { %2496 = vmatmul.mubr.msk.f32.vlgmr.msra.gmra.mxu1 %vm423_vm2, %v2803_v39  ;;  %2518 = vmatprep.subr.mxu0 %v2666_v11 }
 0x168   :  { %2504 = vmatpush3.xpose.msk.msra.mxu1 %vm423_vm2, %v2815_v40  ;;  %2505 = vmatprep.mubr.msk.f32.mxu1 %vm2667_vm1, %v2666_v11 }
 0x169   :  { %2513 = vmatprep.subr.mxu1 %v2666_v11 }
 0x16b   :  { %2506 = vmatmul.mubr.msk.f32.vlgmr.msra.gmra.mxu1 %vm423_vm2, %v2815_v40 }
 0x16c   :  { %2514 = vmatpush3.msra.mxu1 %v352_v33  ;;  %2515 = vmatprep.mubr.msk.f32.mxu1 %vm2667_vm1, %v2666_v11 }
 0x16d   :  { %2523 = vmatprep.subr.mxu1 %v2666_v11 }
 0x21b   :  { %v493_v41 = vpop.f32.mrf.mxu1  ;;  %v639_v42 = vpop.f32.mrf.mxu0 }
 0x21c   :  { %v1008_v43 = vmul.f32 0.35355338, %v493_v41  ;;  %v1010_v46 = vmul.f32 0.35355338, %v639_v42 }
 0x21d   :  { %v2472_v44 = vpop.f32.mrf.mxu1  ;;  %v2482_v45 = vpop.f32.mrf.mxu0 }
 0x21e   :  { %v1016_v47 = vsel %vm423_vm2, %v1008_v43, -inf  ;;  %v1022_v54 = vsel %vm423_vm2, %v1010_v46, -inf }
 0x21f   :  { %1017 = vmax.xlane.f32.xlu0 %v1016_v47  ;;  %v566_v48 = vpop.f32.mrf.mxu1 }
 0x220   :  { %v1009_v49 = vmul.f32 0.35355338, %v566_v48  ;;  %v785_v50 = vpop.f32.mrf.mxu0 }
 0x221   :  { %v2477_v51 = vpop.f32.mrf.mxu1  ;;  %v1012_v52 = vmul.f32 0.35355338, %v785_v50 }
 0x222   :  { %v2492_v53 = vpop.f32.mrf.mxu0  ;;  %v1019_v55 = vsel %vm423_vm2, %v1009_v49, -inf }
 0x223   :  { %1023 = vmax.xlane.f32.xlu0 %v1022_v54  ;;  %1020 = vmax.xlane.f32.xlu1 %v1019_v55  ;;  %v712_v56 = vpop.f32.mrf.mxu1  ;;  %v1028_v63 = vsel %vm423_vm2, %v1012_v52, -inf }
 0x224   :  { %v1011_v57 = vmul.f32 0.35355338, %v712_v56  ;;  %v931_v58 = vpop.f32.mrf.mxu0 }
 0x225   :  { %v2487_v59 = vpop.f32.mrf.mxu1  ;;  %v1014_v60 = vmul.f32 0.35355338, %v931_v58 }
 0x226   :  { %v2502_v61 = vpop.f32.mrf.mxu0  ;;  %v1025_v62 = vsel %vm423_vm2, %v1011_v57, -inf }
 0x227   :  { %1026 = vmax.xlane.f32.xlu0 %v1025_v62  ;;  %v858_v0 = vpop.f32.mrf.mxu1  ;;  %1029 = vmax.xlane.f32.xlu1 %v1028_v63  ;;  %v1034_v6 = vsel %vm423_vm2, %v1014_v60, -inf }
 0x228   :  { %v1013_v1 = vmul.f32 0.35355338, %v858_v0 }
 0x229   :  { %v2497_v3 = vpop.f32.mrf.mxu1 }
 0x22a   :  { %v1031_v4 = vsel %vm423_vm2, %v1013_v1, -inf }
 0x22b   :  { %1032 = vmax.xlane.f32.xlu0 %v1031_v4  ;;  %v1004_v7 = vpop.f32.mrf.mxu1  ;;  %1035 = vmax.xlane.f32.xlu1 %v1034_v6 }
 0x22c   :  { %v1015_v8 = vmul.f32 0.35355338, %v1004_v7 }
 0x22d   :  { %v2507_v9 = vpop.f32.mrf.mxu1 }
 0x22e   :  { %v1037_v10 = vsel %vm423_vm2, %v1015_v8, -inf }
 0x22f   :  { %1038 = vmax.xlane.f32.xlu0 %v1037_v10 }
 0x2a8   :  { %v1018_v12 = vpop.xlane.xlu0 %1017 }
 0x2a9   :  { %v1040_v13 = vsub.f32 %v1008_v43, %v1018_v12 }
 0x2ab   :  { %v1048_v14 = vmul.f32 1.442695, %v1040_v13 }
 0x2ac   :  { %v1021_v15 = vpop.xlane.xlu1 %1020  ;;  %v1024_v16 = vpop.xlane.xlu0 %1023 }
 0x2ad   :  { %2601 = vpow2.f32 %v1048_v14  ;;  %v1041_v17 = vsub.f32 %v1009_v49, %v1021_v15  ;;  %v1042_v18 = vsub.f32 %v1010_v46, %v1024_v16 }
 0x2af   :  { %v1050_v19 = vmul.f32 1.442695, %v1041_v17  ;;  %v1052_v20 = vmul.f32 1.442695, %v1042_v18 }
 0x2b0   :  { %v1030_v21 = vpop.xlane.xlu1 %1029  ;;  %v1027_v23 = vpop.xlane.xlu0 %1026 }
 0x2b1   :  { %2603 = vpow2.f32 %v1050_v19  ;;  %v1044_v24 = vsub.f32 %v1012_v52, %v1030_v21  ;;  %v1043_v26 = vsub.f32 %v1011_v57, %v1027_v23 }
 0x2b2   :  { %2605 = vpow2.f32 %v1052_v20 }
 0x2b3   :  { %v1056_v27 = vmul.f32 1.442695, %v1044_v24  ;;  %v1054_v28 = vmul.f32 1.442695, %v1043_v26 }
 0x2b4   :  { %v1036_v30 = vpop.xlane.xlu1 %1035  ;;  %v1033_v31 = vpop.xlane.xlu0 %1032 }
 0x2b5   :  { %2607 = vpow2.f32 %v1056_v27  ;;  %v1046_v32 = vsub.f32 %v1014_v60, %v1036_v30  ;;  %v1045_v33 = vsub.f32 %v1013_v1, %v1033_v31 }
 0x2b6   :  { %2609 = vpow2.f32 %v1054_v28 }
 0x2b7   :  { %v1060_v35 = vmul.f32 1.442695, %v1046_v32  ;;  %v1058_v36 = vmul.f32 1.442695, %v1045_v33 }
 0x2b8   :  { %v1039_v41 = vpop.xlane.xlu0 %1038 }
 0x2b9   :  { %2611 = vpow2.f32 %v1060_v35  ;;  %v1047_v42 = vsub.f32 %v1015_v8, %v1039_v41 }
 0x2ba   :  { %v2602_v43 = vpop.eup %2601  ;;  %2613 = vpow2.f32 %v1058_v36 }
 0x2bb   :  { %v1062_v44 = vmul.f32 1.442695, %v1047_v42  ;;  %v1064_v45 = vsel %vm423_vm2, %v2602_v43, 0.0 }
 0x2bc   :  { %1065 = vadd.xlane.f32.xlu1 %v1064_v45 }
 0x2bd   :  { %2615 = vpow2.f32 %v1062_v44 }
 0x2be   :  { %v2604_v46 = vpop.eup %2603 }
 0x2bf   :  { %v2606_v47 = vpop.eup %2605  ;;  %v1067_v48 = vsel %vm423_vm2, %v2604_v46, 0.0 }
 0x2c0   :  { %1068 = vadd.xlane.f32.xlu0 %v1067_v48  ;;  %v1070_v49 = vsel %vm423_vm2, %v2606_v47, 0.0 }
 0x2c1   :  { %1071 = vadd.xlane.f32.xlu1 %v1070_v49 }
 0x2c2   :  { %v2608_v50 = vpop.eup %2607 }
 0x2c3   :  { %v2610_v51 = vpop.eup %2609  ;;  %v1076_v52 = vsel %vm423_vm2, %v2608_v50, 0.0 }
 0x2c4   :  { %v1073_v53 = vsel %vm423_vm2, %v2610_v51, 0.0 }
 0x2c5   :  { %1077 = vadd.xlane.f32.xlu1 %v1076_v52  ;;  %1074 = vadd.xlane.f32.xlu0 %v1073_v53 }
 0x2c6   :  { %v2612_v54 = vpop.eup %2611 }
 0x2c7   :  { %v2614_v55 = vpop.eup %2613  ;;  %v1082_v56 = vsel %vm423_vm2, %v2612_v54, 0.0 }
 0x2c8   :  { %v1079_v57 = vsel %vm423_vm2, %v2614_v55, 0.0 }
 0x2c9   :  { %1083 = vadd.xlane.f32.xlu1 %v1082_v56  ;;  %1080 = vadd.xlane.f32.xlu0 %v1079_v57 }
 0x2ca   :  { %v2616_v58 = vpop.eup %2615 }
 0x2cb   :  { %v1085_v59 = vsel %vm423_vm2, %v2616_v58, 0.0 }
 0x2cd   :  { %1086 = vadd.xlane.f32.xlu0 %v1085_v59 }
 0x345   :  { %v1066_v60 = vpop.xlane.xlu1 %1065 }
 0x346   :  { %2617 = vrcp.f32 %v1066_v60 }
 0x349   :  { %v1069_v61 = vpop.xlane.xlu0 %1068 }
 0x34a   :  { %v1072_v62 = vpop.xlane.xlu1 %1071  ;;  %2619 = vrcp.f32 %v1069_v61 }
 0x34b   :  { %2621 = vrcp.f32 %v1072_v62 }
 0x34e   :  { %v1078_v63 = vpop.xlane.xlu1 %1077  ;;  %v1075_v0 = vpop.xlane.xlu0 %1074 }
 0x34f   :  { %2623 = vrcp.f32 %v1078_v63 }
 0x350   :  { %2625 = vrcp.f32 %v1075_v0  ;;  %v24_v0 = vld [vmem:[%s3004_s1 + $0x38] sm:$0xff] }
 0x352   :  { %v1084_v1 = vpop.xlane.xlu1 %1083  ;;  %v1081_v3 = vpop.xlane.xlu0 %1080 }
 0x353   :  { %v2618_v4 = vpop.eup %2617  ;;  %2627 = vrcp.f32 %v1084_v1 }
 0x354   :  { %2629 = vrcp.f32 %v1081_v3  ;;  %v1089_v6 = vmul.f32 %v2618_v4, %v2602_v43 }
 0x356   :  { %v1087_v7 = vpop.xlane.xlu0 %1086  ;;  %2511 = vmatmul.mubr.msk.f32.vlgmr.msra.gmra.mxu0 %vm423_vm2, %v1089_v6 }
 0x357   :  { %v2620_v8 = vpop.eup %2619  ;;  %2631 = vrcp.f32 %v1087_v7  ;;  %2519 = vmatpush3.msra.mxu0 %v2762_v25  ;;  %2520 = vmatprep.mubr.msk.f32.mxu0 %vm2667_vm1, %v2666_v11 }
 0x358   :  { %v2622_v9 = vpop.eup %2621  ;;  %2528 = vmatprep.subr.mxu0 %v2666_v11  ;;  %v1091_v10 = vmul.f32 %v2620_v8, %v2604_v46 }
 0x359   :  { %v1093_v12 = vmul.f32 %v2622_v9, %v2606_v47 }
 0x35a   :  { %2516 = vmatmul.mubr.msk.f32.vlgmr.msra.gmra.mxu1 %vm423_vm2, %v1091_v10 }
 0x35b   :  { %2521 = vmatmul.mubr.msk.f32.vlgmr.msra.gmra.mxu0 %vm423_vm2, %v1093_v12  ;;  %2524 = vmatpush3.msra.mxu1 %v2785_v37 }
 0x35c   :  { %v2624_v13 = vpop.eup %2623  ;;  %2529 = vmatpush3.msra.mxu0 %v2774_v34  ;;  %2525 = vmatprep.mubr.msk.f32.mxu1 %vm2667_vm1, %v2666_v11 }
 0x35d   :  { %v2626_v25 = vpop.eup %2625  ;;  %2530 = vmatprep.mubr.msk.f32.mxu0 %vm2667_vm1, %v2666_v11  ;;  %2533 = vmatprep.subr.mxu1 %v2666_v11  ;;  %v1097_v14 = vmul.f32 %v2624_v13, %v2608_v50 }
 0x35e   :  { %2538 = vmatprep.subr.mxu0 %v2666_v11  ;;  %v1095_v15 = vmul.f32 %v2626_v25, %v2610_v51 }
 0x35f   :  { %2531 = vmatmul.mubr.msk.f32.vlgmr.msra.gmra.mxu0 %vm423_vm2, %v1097_v14 }
 0x360   :  { %v2628_v16 = vpop.eup %2627  ;;  %2526 = vmatmul.mubr.msk.f32.vlgmr.msra.gmra.mxu1 %vm423_vm2, %v1095_v15  ;;  %2539 = vmatpush3.msra.mxu0 %v2790_v38 }
 0x361   :  { %v2630_v34 = vpop.eup %2629  ;;  %2534 = vmatpush3.msra.mxu1 %v2803_v39  ;;  %2535 = vmatprep.mubr.msk.f32.mxu1 %vm2667_vm1, %v2666_v11  ;;  %v1101_v37 = vmul.f32 %v2628_v16, %v2612_v54 }
 0x362   :  { %2540 = vmatprep.mubr.msk.f32.mxu0 %vm2667_vm1, %v2666_v11  ;;  %2543 = vmatprep.subr.mxu1 %v2666_v11  ;;  %v1099_v17 = vmul.f32 %v2630_v34, %v2614_v55 }
 0x363   :  { %2541 = vmatmul.mubr.msk.f32.vlgmr.msra.gmra.mxu0 %vm423_vm2, %v1101_v37  ;;  %2548 = vmatprep.subr.mxu0 %v24_v0 }
 0x364   :  { %v2632_v18 = vpop.eup %2631  ;;  %2536 = vmatmul.mubr.msk.f32.vlgmr.msra.gmra.mxu1 %vm423_vm2, %v1099_v17  ;;  %2549 = vmatpush3.msra.mxu0 %v24_v0  ;;  %v23_v17 = vld [vmem:[%s3004_s1 + $0x30] sm:$0xff] }
 0x365   :  { %2544 = vmatpush3.msra.mxu1 %v2815_v40  ;;  %2545 = vmatprep.mubr.msk.f32.mxu1 %vm2667_vm1, %v2666_v11  ;;  %v1103_v38 = vmul.f32 %v2632_v18, %v2616_v58 }
 0x366   :  { %2550 = vmatprep.subr.mxu0 %v23_v17 }
 0x367   :  { %2551 = vmatpush3.msra.mxu0 %v23_v17 }
 0x368   :  { %2546 = vmatmul.mubr.msk.f32.vlgmr.msra.gmra.mxu1 %vm423_vm2, %v1103_v38 }
 0x416   :  { %v1173_v39 = vpop.f32.mrf.mxu0 }
 0x418   :  { %v2512_v19 = vpop.f32.mrf.mxu0 }
 0x41a   :  { %v1246_v20 = vpop.f32.mrf.mxu1 }
 0x41b   :  { %v1319_v21 = vpop.f32.mrf.mxu0 }
 0x41c   :  { %v2517_v23 = vpop.f32.mrf.mxu1  ;;  %v1688_v26 = vcombine.low %v1173_v39, %v1319_v21  ;;  %v1689_v27 = vcombine.high %v1173_v39, %v1319_v21  ;;  %v22_v39 = vld [vmem:[%s3004_s1 + $0x28] sm:$0xff] }
 0x41d   :  { %v2522_v24 = vpop.f32.mrf.mxu0  ;;  %2552 = vmatprep.subr.mxu0 %v22_v39 }
 0x41e   :  { %v1696_v35 = vrot.slane %v1688_v26, %v2730_v22  ;;  %v1703_v11 = vrot.slane %v1689_v27, %v2730_v22  ;;  %2553 = vmatpush3.msra.mxu0 %v22_v39  ;;  %v27_v39 = vld [vmem:[%s3004_s1 + $0x50] sm:$0xff] }
 0x41f   :  { %v1465_v28 = vpop.f32.mrf.mxu0 }
 0x420   :  { %v1392_v30 = vpop.f32.mrf.mxu1 }
 0x421   :  { %v1704_v31 = vcombine.low %v1246_v20, %v1392_v30  ;;  %v1705_v32 = vcombine.high %v1246_v20, %v1392_v30  ;;  %v2532_v33 = vpop.f32.mrf.mxu0 }
 0x422   :  { %v2527_v40 = vpop.f32.mrf.mxu1 }
 0x423   :  { %v1712_v36 = vrot.slane %v1704_v31, %v2730_v22  ;;  %v1719_v41 = vrot.slane %v1705_v32, %v2730_v22  ;;  %v1611_v42 = vpop.f32.mrf.mxu0  ;;  %v21_v40 = vld [vmem:[%s3004_s1 + $0x20] sm:$0xff] }
 0x424   :  { %v1538_v43 = vpop.f32.mrf.mxu1  ;;  %v1756_v54 = vcombine.low %v1465_v28, %v1611_v42  ;;  %v1757_v55 = vcombine.high %v1465_v28, %v1611_v42  ;;  %2554 = vmatprep.subr.mxu0 %v21_v40 }
 0x425   :  { %v1720_v44 = vcombine.low %v1696_v35, %v1712_v36  ;;  %v1721_v45 = vcombine.high %v1696_v35, %v1712_v36  ;;  %v1736_v46 = vcombine.low %v1703_v11, %v1719_v41  ;;  %v1737_v47 = vcombine.high %v1703_v11, %v1719_v41  ;;  %v2542_v48 = vpop.f32.mrf.mxu0  ;;  %2555 = vmatpush3.msra.mxu0 %v21_v40 }
 0x426   :  { %v2537_v49 = vpop.f32.mrf.mxu1  ;;  %v1764_v7 = vrot.slane %v1756_v54, %v2730_v22  ;;  %v1771_v8 = vrot.slane %v1757_v55, %v2730_v22 }
 0x427   :  { %v1728_v50 = vrot.slane %v1720_v44, %v2732_v29  ;;  %v1735_v51 = vrot.slane %v1721_v45, %v2732_v29  ;;  %v1744_v52 = vrot.slane %v1736_v46, %v2732_v29  ;;  %v1751_v53 = vrot.slane %v1737_v47, %v2732_v29 }
 0x428   :  { %v1684_v56 = vpop.f32.mrf.mxu1 }
 0x429   :  { %v1824_v57 = vcombine.low %v1728_v50, %v1735_v51  ;;  %v2380_v58 = vcombine.high %v1728_v50, %v1735_v51  ;;  %v1840_v59 = vcombine.low %v1744_v52, %v1751_v53  ;;  %v2381_v60 = vcombine.high %v1744_v52, %v1751_v53 }
 0x42a   :  { %v1772_v61 = vcombine.low %v1538_v43, %v1684_v56  ;;  %v1773_v62 = vcombine.high %v1538_v43, %v1684_v56  ;;  %v2547_v63 = vpop.f32.mrf.mxu1 }
 0x42b   :  { %v1831_v1 = vrot.slane %v1824_v57, %v2730_v22  ;;  %v1839_v3 = vrot.slane %v2380_v58, %v2730_v22  ;;  %v1847_v4 = vrot.slane %v1840_v59, %v2730_v22  ;;  %v1855_v6 = vrot.slane %v2381_v60, %v2730_v22 }
 0x42c   :  { %v1780_v9 = vrot.slane %v1772_v61, %v2730_v22  ;;  %v1787_v10 = vrot.slane %v1773_v62, %v2730_v22 }
 0x42d   :  { %v1856_v12 = vcombine.low %v1831_v1, %v1839_v3  ;;  %v1872_v13 = vcombine.low %v1847_v4, %v1855_v6  ;;  %v1857_v25 = vcombine.high %v1831_v1, %v1839_v3  ;;  %v1873_v14 = vcombine.high %v1847_v4, %v1855_v6  ;;  %v2384_v3 = vld [vmem:[%s3005_s2 + $0x1] ss:$0 sm:$0xff] }
 0x42e   :  { %v1788_v15 = vcombine.low %v1764_v7, %v1780_v9  ;;  %v1789_v16 = vcombine.high %v1764_v7, %v1780_v9  ;;  %v1804_v34 = vcombine.low %v1771_v8, %v1787_v10  ;;  %v1805_v37 = vcombine.high %v1771_v8, %v1787_v10 }
 0x42f   :  { %v1864_v18 = vrot.slane %v1856_v12, %v2732_v29  ;;  %v1880_v38 = vrot.slane %v1872_v13, %v2732_v29  ;;  %v1871_v26 = vrot.slane %v1857_v25, %v2732_v29  ;;  %v1887_v27 = vrot.slane %v1873_v14, %v2732_v29 }
 0x430   :  { %v1796_v19 = vrot.slane %v1788_v15, %v2732_v29  ;;  %v1803_v20 = vrot.slane %v1789_v16, %v2732_v29  ;;  %v1812_v21 = vrot.slane %v1804_v34, %v2732_v29  ;;  %v1819_v23 = vrot.slane %v1805_v37, %v2732_v29 }
 0x431   :  { %v1889_v24 = vcombine.high %v1864_v18, %v1880_v38  ;;  %v1888_v28 = vcombine.low %v1864_v18, %v1880_v38  ;;  %v1890_v42 = vcombine.low %v1871_v26, %v1887_v27  ;;  %v1891_v54 = vcombine.high %v1871_v26, %v1887_v27  ;;  %v33_v26 = vld [vmem:[%s3004_s1 + $0x80] sm:$0xff] }
 0x432   :  { %v1892_v30 = vcombine.low %v1796_v19, %v1803_v20  ;;  %v2382_v31 = vcombine.high %v1796_v19, %v1803_v20  ;;  %v1908_v32 = vcombine.low %v1812_v21, %v1819_v23  ;;  %v2383_v33 = vcombine.high %v1812_v21, %v1819_v23  ;;  %v26_v19 = vld [vmem:[%s3004_s1 + $0x48] sm:$0xff]  ;;  %v25_v20 = vld [vmem:[%s3004_s1 + $0x40] sm:$0xff]  ;;  %v36_v21 = vld [vmem:[%s3004_s1 + $0x98] sm:$0xff] }
 0x433   :  { %1962 = vrot.lane.b32.xlu1 %v1889_v24, %s2670_s9  ;;  %v35_v23 = vld [vmem:[%s3004_s1 + $0x90] sm:$0xff]  ;;  %2570 = vmatprep.subr.mxu0 %v36_v21  ;;  %v34_v24 = vld [vmem:[%s3004_s1 + $0x88] sm:$0xff] }
 0x434   :  { %v1899_v35 = vrot.slane %v1892_v30, %v2730_v22  ;;  %v1907_v11 = vrot.slane %v2382_v31, %v2730_v22  ;;  %v1915_v36 = vrot.slane %v1908_v32, %v2730_v22  ;;  %v1923_v41 = vrot.slane %v2383_v33, %v2730_v22 }
 0x436   :  { %v1925_v43 = vcombine.high %v1899_v35, %v1907_v11  ;;  %v1941_v44 = vcombine.high %v1915_v36, %v1923_v41  ;;  %v1924_v45 = vcombine.low %v1899_v35, %v1907_v11  ;;  %v1940_v46 = vcombine.low %v1915_v36, %v1923_v41  ;;  %v2387_v35 = vld [vmem:[%s3005_s2 + $0x4] ss:$0 sm:$0xff]  ;;  %v2388_v36 = vld [vmem:[%s3005_s2 + $0x5] ss:$0 sm:$0xff] }
 0x437   :  { %1970 = vrot.lane.b32.xlu1 %v1890_v42, %s2671_s10 }
 0x438   :  { %v1939_v47 = vrot.slane %v1925_v43, %v2732_v29  ;;  %v1955_v48 = vrot.slane %v1941_v44, %v2732_v29  ;;  %v1932_v49 = vrot.slane %v1924_v45, %v2732_v29  ;;  %v1948_v50 = vrot.slane %v1940_v46, %v2732_v29 }
 0x43a   :  { %v1958_v51 = vcombine.low %v1939_v47, %v1955_v48  ;;  %v1957_v52 = vcombine.high %v1932_v49, %v1948_v50  ;;  %v1956_v53 = vcombine.low %v1932_v49, %v1948_v50  ;;  %v1959_v22 = vcombine.high %v1939_v47, %v1955_v48  ;;  %v32_v47 = vld [vmem:[%s3004_s1 + $0x78] sm:$0xff]  ;;  %v31_v48 = vld [vmem:[%s3004_s1 + $0x70] sm:$0xff]  ;;  %v30_v49 = vld [vmem:[%s3004_s1 + $0x68] sm:$0xff] }
 0x43b   :  { %v29_v50 = vld [vmem:[%s3004_s1 + $0x60] sm:$0xff] }
 0x43c   :  { %1972 = vrot.lane.b32.xlu1 %v1958_v51, %s2671_s10  ;;  %1964 = vrot.lane.b32.xlu0 %v1957_v52, %s2670_s9  ;;  %v2389_v51 = vld [vmem:[%s3005_s2 + $0x2] ss:$0 sm:$0xff] }
 0x440   :  { %1980 = vrot.lane.b32.xlu1 %v1959_v22, %s2672_s11  ;;  %1978 = vrot.lane.b32.xlu0 %v1891_v54, %s2672_s11 }
 0x4a5   :  { %v1963_v55 = vpop.permute.xlu1 %1962 }
 0x4a6   :  { %v1984_v29 = vsel %vm423_vm2, %v1888_v28, %v1963_v55 }
 0x4a9   :  { %v1971_v56 = vpop.permute.xlu1 %1970 }
 0x4aa   :  { %v1987_v60 = vsel %vm1986_vm3, %v1984_v29, %v1971_v56 }
 0x4ae   :  { %v1973_v57 = vpop.permute.xlu1 %1972  ;;  %v1965_v58 = vpop.permute.xlu0 %1964 }
 0x4af   :  { %v1985_v59 = vsel %vm423_vm2, %v1956_v53, %v1965_v58 }
 0x4b0   :  { %v1988_v62 = vsel %vm1986_vm3, %v1985_v59, %v1973_v57  ;;  %v2392_v57 = vld [vmem:[%s3005_s2 + $0x3] ss:$0 sm:$0xff] }
 0x4b2   :  { %v1981_v61 = vpop.permute.xlu1 %1980  ;;  %v1979_v63 = vpop.permute.xlu0 %1978 }
 0x4b3   :  { %v1991_v0 = vsel %vm1989_vm4, %v1988_v62, %v1981_v61  ;;  %v1990_v1 = vsel %vm1989_vm4, %v1987_v60, %v1979_v63 }
 0x4b4   :  { %2556 = vmatprep.mubr.msk.f32.mxu0 %vm49_vm0, %v1990_v1 }
 0x4b5   :  { %2557 = vmatmul.mubr.msk.f32.vlgmr.msra.gmra.mxu0 %vm49_vm0, %v1991_v0 }
 0x4b6   :  { %2571 = vmatpush3.msra.mxu0 %v36_v21 }
 0x4b7   :  { %2572 = vmatprep.subr.mxu0 %v35_v23 }
 0x4b8   :  { %2573 = vmatpush3.msra.mxu0 %v35_v23 }
 0x4b9   :  { %2574 = vmatprep.subr.mxu0 %v34_v24 }
 0x4ba   :  { %2575 = vmatpush3.msra.mxu0 %v34_v24 }
 0x4bb   :  { %2576 = vmatprep.subr.mxu0 %v33_v26 }
 0x4bc   :  { %2577 = vmatpush3.msra.mxu0 %v33_v26 }
 0x4bd   :  { %2578 = vmatprep.subr.mxu0 %v32_v47 }
 0x4be   :  { %2579 = vmatpush3.msra.mxu0 %v32_v47 }
 0x4bf   :  { %2580 = vmatprep.subr.mxu0 %v31_v48 }
 0x4c0   :  { %2581 = vmatpush3.msra.mxu0 %v31_v48 }
 0x4c1   :  { %2582 = vmatprep.subr.mxu0 %v30_v49 }
 0x4c2   :  { %2583 = vmatpush3.msra.mxu0 %v30_v49 }
 0x4c3   :  { %2584 = vmatprep.subr.mxu0 %v29_v50 }
 0x4c4   :  { %2585 = vmatpush3.msra.mxu0 %v29_v50 }
 0x575   :  { %v2558_v4 = vpop.f32.mrf.mxu0 }
 0x576   :  { %v2074_v6 = vadd.f32 %v2558_v4, %v2384_v3 }
 0x577   :  { %v2068_v7 = vpop.f32.mrf.mxu0 }
 0x578   :  { %v2069_v8 = vadd.f32 %v2384_v3, %v2068_v7  ;;  %v2078_v9 = vadd.f32 %v2074_v6, %v2717_v5 }
 0x57a   :  { %v2082_v10 = vsel %vm49_vm0, %v2078_v9, 0.0  ;;  %v2077_v12 = vadd.f32 %v2069_v8, %v2704_v2  ;;  %v28_v2 = vld [vmem:[%s3004_s1 + $0x58] sm:$0xff] }
 0x57b   :  { %2083 = vadd.xlane.f32.xlu1 %v2082_v10  ;;  %2559 = vmatprep.subr.mxu1 %v28_v2 }
 0x57c   :  { %v2079_v13 = vsel %vm49_vm0, %v2077_v12, 0.0  ;;  %2560 = vmatpush3.msra.mxu1 %v28_v2  ;;  %v2396_v2 = vld [vmem:[%s3005_s2 + $0x7] ss:$0 sm:$0xff] }
 0x57d   :  { %2080 = vadd.xlane.f32.xlu0 %v2079_v13  ;;  %2561 = vmatprep.subr.mxu1 %v27_v39 }
 0x57e   :  { %2562 = vmatpush3.msra.mxu1 %v27_v39 }
 0x57f   :  { %2563 = vmatprep.subr.mxu1 %v26_v19 }
 0x580   :  { %2564 = vmatpush3.msra.mxu1 %v26_v19 }
 0x581   :  { %2565 = vmatprep.subr.mxu1 %v25_v20 }
 0x582   :  { %2566 = vmatpush3.msra.mxu1 %v25_v20 }
 0x604   :  { %v2084_v25 = vpop.xlane.xlu1 %2083 }
 0x605   :  { %v2087_v14 = vmul.f32 0.03125, %v2084_v25 }
 0x606   :  { %v2081_v15 = vpop.xlane.xlu0 %2080 }
 0x607   :  { %v2086_v16 = vmul.f32 0.03125, %v2081_v15  ;;  %v2089_v34 = vsub.f32 %v2078_v9, %v2087_v14 }
 0x609   :  { %v2088_v37 = vsub.f32 %v2077_v12, %v2086_v16  ;;  %v2091_v38 = vmul.f32 %v2089_v34, %v2089_v34 }
 0x60b   :  { %v2090_v17 = vmul.f32 %v2088_v37, %v2088_v37  ;;  %v2095_v5 = vsel %vm49_vm0, %v2091_v38, 0.0 }
 0x60d   :  { %v2092_v18 = vsel %vm49_vm0, %v2090_v17, 0.0 }
 0x60e   :  { %2093 = vadd.xlane.f32.xlu0 %v2092_v18  ;;  %v2395_v18 = vld [vmem:[%s3005_s2 + $0x6] ss:$0 sm:$0xff] }
 0x612   :  { %2096 = vadd.xlane.f32.xlu0 %v2095_v5 }
 0x697   :  { %v2094_v27 = vpop.xlane.xlu0 %2093 }
 0x698   :  { %v2098_v28 = vmul.f32 0.03125, %v2094_v27 }
 0x69a   :  { %v2100_v30 = vadd.f32 1e-05, %v2098_v28 }
 0x69b   :  { %v2097_v31 = vpop.xlane.xlu0 %2096 }
 0x69c   :  { %2633 = vrsqrt.f32 %v2100_v30  ;;  %v2099_v32 = vmul.f32 0.03125, %v2097_v31 }
 0x69e   :  { %v2101_v33 = vadd.f32 1e-05, %v2099_v32 }
 0x6a0   :  { %2635 = vrsqrt.f32 %v2101_v33 }
 0x6a9   :  { %v2634_v40 = vpop.eup %2633 }
 0x6aa   :  { %v2104_v11 = vmul.f32 %v2634_v40, %v2088_v37 }
 0x6ac   :  { %v2110_v41 = vmul.f32 %v2387_v35, %v2104_v11 }
 0x6ad   :  { %v2636_v42 = vpop.eup %2635 }
 0x6ae   :  { %v2105_v43 = vmul.f32 %v2636_v42, %v2089_v34  ;;  %v2116_v44 = vadd.f32 %v2388_v36, %v2110_v41 }
 0x6b0   :  { %v2111_v45 = vmul.f32 %v2387_v35, %v2105_v43  ;;  %2567 = vmatprep.mubr.msk.f32.mxu1 %vm49_vm0, %v2116_v44 }
 0x6b2   :  { %v2117_v46 = vadd.f32 %v2388_v36, %v2111_v45 }
 0x6b4   :  { %2568 = vmatmul.mubr.msk.f32.vlgmr.msra.gmra.mxu1 %vm49_vm0, %v2117_v46 }
 0x774   :  { %v2569_v52 = vpop.f32.mrf.mxu1 }
 0x775   :  { %v2200_v53 = vadd.f32 %v2569_v52, %v2389_v51 }
 0x776   :  { %v2194_v22 = vpop.f32.mrf.mxu1 }
 0x777   :  { %v2195_v54 = vadd.f32 %v2389_v51, %v2194_v22  ;;  %v2204_v56 = vmax.f32 %v2200_v53, 0.0 }
 0x779   :  { %v2203_v55 = vmax.f32 %v2195_v54, 0.0 }
 0x77b   :  { %2586 = vmatprep.mubr.msk.f32.mxu0 %vm2209_vm5, %v2203_v55 }
 0x77c   :  { %2587 = vmatmul.mubr.msk.f32.vlgmr.msra.gmra.mxu0 %vm2209_vm5, %v2204_v56 }
 0x83c   :  { %v2588_v58 = vpop.f32.mrf.mxu0 }
 0x83d   :  { %v2288_v59 = vadd.f32 %v2588_v58, %v2392_v57 }
 0x83e   :  { %v2282_v29 = vpop.f32.mrf.mxu0 }
 0x83f   :  { %v2283_v60 = vadd.f32 %v2392_v57, %v2282_v29  ;;  %v2292_v61 = vadd.f32 %v2288_v59, %v2117_v46 }
 0x841   :  { %v2296_v62 = vsel %vm49_vm0, %v2292_v61, 0.0  ;;  %v2291_v63 = vadd.f32 %v2283_v60, %v2116_v44 }
 0x842   :  { %2297 = vadd.xlane.f32.xlu0 %v2296_v62 }
 0x843   :  { %v2293_v0 = vsel %vm49_vm0, %v2291_v63, 0.0 }
 0x844   :  { %2294 = vadd.xlane.f32.xlu1 %v2293_v0 }
 0x8cb   :  { %v2298_v1 = vpop.xlane.xlu0 %2297 }
 0x8cc   :  { %v2300_v3 = vmul.f32 0.03125, %v2298_v1 }
 0x8cd   :  { %v2295_v4 = vpop.xlane.xlu1 %2294 }
 0x8ce   :  { %v2302_v6 = vsub.f32 %v2292_v61, %v2300_v3  ;;  %v2299_v7 = vmul.f32 0.03125, %v2295_v4 }
 0x8d0   :  { %v2301_v8 = vsub.f32 %v2291_v63, %v2299_v7  ;;  %v2304_v9 = vmul.f32 %v2302_v6, %v2302_v6 }
 0x8d2   :  { %v2308_v10 = vsel %vm49_vm0, %v2304_v9, 0.0  ;;  %v2303_v12 = vmul.f32 %v2301_v8, %v2301_v8 }
 0x8d3   :  { %2309 = vadd.xlane.f32.xlu0 %v2308_v10 }
 0x8d4   :  { %v2305_v13 = vsel %vm49_vm0, %v2303_v12, 0.0 }
 0x8d5   :  { %2306 = vadd.xlane.f32.xlu1 %v2305_v13 }
 0x95c   :  { %v2310_v25 = vpop.xlane.xlu0 %2309 }
 0x95d   :  { %v2312_v14 = vmul.f32 0.03125, %v2310_v25 }
 0x95e   :  { %v2307_v15 = vpop.xlane.xlu1 %2306 }
 0x95f   :  { %v2314_v16 = vadd.f32 1e-05, %v2312_v14  ;;  %v2311_v34 = vmul.f32 0.03125, %v2307_v15 }
 0x961   :  { %2637 = vrsqrt.f32 %v2314_v16  ;;  %v2313_v37 = vadd.f32 1e-05, %v2311_v34 }
 0x963   :  { %2639 = vrsqrt.f32 %v2313_v37 }
 0x96e   :  { %v2638_v17 = vpop.eup %2637 }
 0x96f   :  { %v2318_v38 = vmul.f32 %v2638_v17, %v2302_v6 }
 0x970   :  { %v2640_v5 = vpop.eup %2639 }
 0x971   :  { %v2317_v39 = vmul.f32 %v2640_v5, %v2301_v8  ;;  %v2324_v19 = vmul.f32 %v2395_v18, %v2318_v38 }
 0x973   :  { %v2323_v20 = vmul.f32 %v2395_v18, %v2317_v39  ;;  %v2330_v21 = vadd.f32 %v2396_v2, %v2324_v19 }
 0x975   :  { %v2329_v23 = vadd.f32 %v2396_v2, %v2323_v20  ;;  %2332 = vst.msk [vmem:[#allocation2 + $0x8] sm:$0xff] %vm49_vm0, %v2330_v21 }
 0x977   :  { %2331 = vst.msk [vmem:[#allocation2] sm:$0xff] %vm49_vm0, %v2329_v23 }
 0x978   :  { %2652 = shalt.err (!%p2649_p4)
}
 0x979   :  { %s2674_s2 = smov 128  }
 0x97a   :  { %2344 = dma.vmem_to_hbm [thread:$0]  %s2339_s23, 256, %s3006_s3, [#allocation3], %s2674_s2, %s2674_s2, %s2670_s9  }
 0x97b   :  { %2661 = dma.done.wait [#allocation3], 256  }
 0x97c   :  { %2662 = vsyncadd [#allocation3], 4294967040 }
 0x97d   :  { %2348 = vsyncpa [#allocation3], 1 }

</bundles_post_ra>
